<compile_context>
chip_gen: v6e
topology: v6e:2x2x1
jax: 0.10.0
libtpu: 0.0.40
codegen_flags: <defaults>
</compile_context>

<pallas_src>
import functools
from typing import NamedTuple

import jax
import jax.numpy as jnp
from jax.experimental import pallas as pl
from jax.experimental.pallas import tpu as pltpu

_LANE = 128


def _round_up(n: int, m: int) -> int:
    return ((n + m - 1) // m) * m


def _cdiv(a: int, b: int) -> int:
    return -(-a // b)


def _probe_single_buffer() -> bool:
    """True if this jax exposes pl.Buffered and BlockSpec accepts pipeline_mode."""
    if not hasattr(pl, "Buffered"):
        return False
    try:
        pl.BlockSpec((8, 128), lambda i: (0, 0), pipeline_mode=pl.Buffered(1))
        return True
    except Exception:
        return False


_SINGLE_BUFFER_WEIGHTS = _probe_single_buffer()
# Pallas allocates 2 buffers per input BlockSpec by default, even with a constant index_map.
_WEIGHT_BUFFERS = 1 if _SINGLE_BUFFER_WEIGHTS else 2


def _vmem_capacity_bytes() -> int:
    """Physical per-core VMEM; conservative 64 MiB if the query is unavailable."""
    try:
        info = pltpu.get_tpu_info()
        cap = int(getattr(info, "vmem_capacity_bytes", 0))
        if cap > 0:
            return cap
    except Exception:
        pass
    return 64 * 1024 * 1024


def _resident(shape):
    """BlockSpec for a grid-invariant (weight/bias) input, single-buffered when supported."""
    nd = len(shape)
    idx = lambda i: (0,) * nd
    if _SINGLE_BUFFER_WEIGHTS:
        return pl.BlockSpec(shape, idx, pipeline_mode=pl.Buffered(1))
    return pl.BlockSpec(shape, idx)


def _pick_batch_tile(B, sublane, max_tile_b, want_two_steps):
    """Pick (tile_b, b_pad, grid_n): sublane-aligned, low padding waste, >=2 steps on v7x."""
    b_ceil = _round_up(B, sublane)
    grid_n = _cdiv(b_ceil, max_tile_b)
    if want_two_steps and grid_n == 1 and b_ceil >= 2 * sublane:
        grid_n = 2  # use both TensorCores on v7x-like parts
    tile_b = _round_up(_cdiv(b_ceil, grid_n), sublane)
    b_pad = tile_b * grid_n
    return tile_b, b_pad, grid_n


def _pick_feature_tile(d):
    for cand in (512, 384, 256, 128):
        if cand <= d and d % cand == 0:
            return cand
    return d  # d is always a multiple of 128 after padding


class MLPMeta(NamedTuple):
    input_dim: int
    hidden_dim: int
    d_in: int
    d_hid: int
    compute_dtype: object


# --------------------------------------------------------------------------------------
# Parameter preparation (pad + cast ONCE, outside the forward hot path)
# --------------------------------------------------------------------------------------
def prepare_mlp_params(params, *, compute_dtype=jnp.bfloat16):
    """Pad weights to lane multiples and cast to compute dtype once, at init time."""
    cd = jnp.dtype(compute_dtype)
    input_dim, hidden_dim = params["w1"].shape
    d_in = _round_up(input_dim, _LANE)
    d_hid = _round_up(hidden_dim, _LANE)

    def pad_w(w, rows, cols):
        return jnp.zeros((rows, cols), cd).at[: w.shape[0], : w.shape[1]].set(w.astype(cd))

    def pad_b(b, cols):
        return jnp.zeros((1, cols), jnp.float32).at[:, : b.shape[1]].set(b.astype(jnp.float32))

    padded = {
        "w1": pad_w(params["w1"], d_in, d_hid), "b1": pad_b(params["b1"], d_hid),
        "w2": pad_w(params["w2"], d_hid, d_hid), "b2": pad_b(params["b2"], d_hid),
        "w3": pad_w(params["w3"], d_hid, d_in), "b3": pad_b(params["b3"], d_in),
    }
    meta = MLPMeta(input_dim, hidden_dim, d_in, d_hid, cd)
    return padded, meta


# --------------------------------------------------------------------------------------
# Fused, weights-resident kernel (whole MLP per batch tile)
# --------------------------------------------------------------------------------------
def _mlp_fused_kernel(x_ref, w1_ref, b1_ref, w2_ref, b2_ref, w3_ref, b3_ref, o_ref, h_ref):
    cd = w1_ref.dtype
    # Layer 1: Linear(d_in -> d_hid) + ReLU   (MXU accumulates in f32)
    a1 = jnp.dot(x_ref[...], w1_ref[...], preferred_element_type=jnp.float32)
    h_ref[...] = jnp.maximum(a1 + b1_ref[...], 0.0).astype(cd)
    # Layer 2: Linear(d_hid -> d_hid) + ReLU  (same scratch buffer reused)
    a2 = jnp.dot(h_ref[...], w2_ref[...], preferred_element_type=jnp.float32)
    h_ref[...] = jnp.maximum(a2 + b2_ref[...], 0.0).astype(cd)
    # Layer 3: Linear(d_hid -> d_in), no activation
    a3 = jnp.dot(h_ref[...], w3_ref[...], preferred_element_type=jnp.float32)
    o_ref[...] = (a3 + b3_ref[...]).astype(o_ref.dtype)


# --------------------------------------------------------------------------------------
# Streamed fallback: one K-tiled linear(+ReLU) pallas_call per layer
# --------------------------------------------------------------------------------------
def _linear_kernel(relu, x_ref, w_ref, b_ref, o_ref, acc_ref):
    k = pl.program_id(2)

    @pl.when(k == 0)
    def _():
        acc_ref[...] = jnp.zeros_like(acc_ref)

    acc_ref[...] += jnp.dot(x_ref[...], w_ref[...], preferred_element_type=jnp.float32)

    @pl.when(k == pl.num_programs(2) - 1)
    def _():
        y = acc_ref[...] + b_ref[...]
        if relu:
            y = jnp.maximum(y, 0.0)
        o_ref[...] = y.astype(o_ref.dtype)


def _tiled_linear(x, w, b, *, relu, out_dtype, tm, tn, tk, vmem_limit):
    M, K = x.shape
    _, N = w.shape
    return pl.pallas_call(
        functools.partial(_linear_kernel, relu),
        out_shape=jax.ShapeDtypeStruct((M, N), out_dtype),
        grid=(M // tm, N // tn, K // tk),
        in_specs=[
            pl.BlockSpec((tm, tk), lambda i, j, k: (i, k)),
            pl.BlockSpec((tk, tn), lambda i, j, k: (k, j)),
            pl.BlockSpec((1, tn), lambda i, j, k: (0, j)),
        ],
        out_specs=pl.BlockSpec((tm, tn), lambda i, j, k: (i, j)),
        scratch_shapes=[pltpu.VMEM((tm, tn), jnp.float32)],
        compiler_params=pltpu.CompilerParams(
            dimension_semantics=("parallel", "parallel", "arbitrary"),
            vmem_limit_bytes=int(vmem_limit),
        ),
    )(x, w, b)


def _mlp_streamed(x, padded, meta, out_dtype, vmem_limit, tile_b, b_pad):
    B, input_dim = x.shape
    cd = jnp.dtype(meta.compute_dtype)
    d_in, d_hid = meta.d_in, meta.d_hid
    w1, b1, w2, b2, w3, b3 = (padded[k] for k in ("w1", "b1", "w2", "b2", "w3", "b3"))

    if b_pad == B and d_in == input_dim:
        x_p = x if x.dtype == cd else x.astype(cd)
    else:
        x_p = jnp.zeros((b_pad, d_in), cd).at[:B, :input_dim].set(x.astype(cd))

    tn_h = _pick_feature_tile(d_hid)
    tn_i = _pick_feature_tile(d_in)

    h = _tiled_linear(x_p, w1, b1, relu=True, out_dtype=cd,
                      tm=tile_b, tn=tn_h, tk=tn_i, vmem_limit=vmem_limit)
    h = _tiled_linear(h, w2, b2, relu=True, out_dtype=cd,
                      tm=tile_b, tn=tn_h, tk=tn_h, vmem_limit=vmem_limit)
    y = _tiled_linear(h, w3, b3, relu=False, out_dtype=out_dtype,
                      tm=tile_b, tn=tn_i, tk=tn_h, vmem_limit=vmem_limit)
    if b_pad == B and d_in == input_dim:
        return y
    return y[:B, :input_dim]


# --------------------------------------------------------------------------------------
# Forward
# --------------------------------------------------------------------------------------
def mlp_forward(x, padded_params, meta, *, out_dtype=None, max_tile_b=None,
                vmem_cap_bytes=None, force_streaming=False):
    """x: (B, input_dim). padded_params/meta from prepare_mlp_params (pad/cast done once)."""
    B, input_dim = x.shape
    assert input_dim == meta.input_dim, "x feature dim does not match prepared params"
    cd = jnp.dtype(meta.compute_dtype)
    out_dtype = jnp.dtype(x.dtype if out_dtype is None else out_dtype)
    d_in, d_hid = meta.d_in, meta.d_hid
    w1, b1, w2, b2, w3, b3 = (padded_params[k] for k in ("w1", "b1", "w2", "b2", "w3", "b3"))

    # ---- generation-aware VMEM budget & batch tiling ----
    capacity = _vmem_capacity_bytes()
    vmem_cap = capacity * 3 // 4 if vmem_cap_bytes is None else int(vmem_cap_bytes)
    multi_core = capacity <= 64 * 1024 * 1024          # v7x-like: 2 TCs per chip
    sublane = 16 if cd == jnp.dtype(jnp.bfloat16) else 8
    if max_tile_b is None:
        max_tile_b = 256 if multi_core else 512
    max_tile_b = max(sublane, _round_up(max_tile_b, sublane))

    def footprint(tb):
        w_bytes = (w1.size + w2.size + w3.size) * cd.itemsize * _WEIGHT_BUFFERS
        bias_bytes = (b1.size + b2.size + b3.size) * 4 * _WEIGHT_BUFFERS
        x_bytes = 2 * tb * d_in * cd.itemsize          # double-buffered input tile
        o_bytes = 2 * tb * d_in * out_dtype.itemsize   # double-buffered output tile
        h_bytes = tb * d_hid * cd.itemsize             # shared activation scratch
        acc_bytes = tb * max(d_in, d_hid) * 4          # f32 matmul accumulator temps
        return w_bytes + bias_bytes + x_bytes + o_bytes + h_bytes + acc_bytes

    tile_b, b_pad, _ = _pick_batch_tile(B, sublane, max_tile_b, multi_core)
    while footprint(tile_b) > vmem_cap and max_tile_b > sublane:
        max_tile_b = max(sublane, _round_up(max_tile_b // 2, sublane))
        tile_b, b_pad, _ = _pick_batch_tile(B, sublane, max_tile_b, multi_core)

    if force_streaming or footprint(tile_b) > vmem_cap:
        # Weights don't fit resident in VMEM -> stream them with K-tiled per-layer matmuls.
        return _mlp_streamed(x, padded_params, meta, out_dtype, vmem_cap, tile_b, b_pad)

    # ---- stage x (pad / cast only when actually needed) ----
    if b_pad == B and d_in == input_dim:
        x_p = x if x.dtype == cd else x.astype(cd)
    else:
        x_p = jnp.zeros((b_pad, d_in), cd).at[:B, :input_dim].set(x.astype(cd))

    fp = footprint(tile_b)
    vmem_limit = int(min(capacity, max(fp * 5 // 4, 32 * 1024 * 1024)))

    flops = 2 * b_pad * (d_in * d_hid + d_hid * d_hid + d_hid * d_in)
    bytes_accessed = ((w1.size + w2.size + w3.size) * cd.itemsize
                      + (b1.size + b2.size + b3.size) * 4
                      + b_pad * d_in * (cd.itemsize + out_dtype.itemsize))
    cost = pl.CostEstimate(flops=flops, transcendentals=0, bytes_accessed=bytes_accessed)

    out_padded = pl.pallas_call(
        _mlp_fused_kernel,
        out_shape=jax.ShapeDtypeStruct((b_pad, d_in), out_dtype),
        grid=(b_pad // tile_b,),
        in_specs=[
            pl.BlockSpec((tile_b, d_in), lambda i: (i, 0)),  # x: tiled over batch
            _resident(w1.shape), _resident(b1.shape),
            _resident(w2.shape), _resident(b2.shape),
            _resident(w3.shape), _resident(b3.shape),
        ],
        out_specs=pl.BlockSpec((tile_b, d_in), lambda i: (i, 0)),
        scratch_shapes=[pltpu.VMEM((tile_b, d_hid), cd)],    # reused for h1 and h2
        compiler_params=pltpu.CompilerParams(
            dimension_semantics=("parallel",),
            vmem_limit_bytes=vmem_limit,
        ),
        cost_estimate=cost,
    )(x_p, w1, b1, w2, b2, w3, b3)

    if b_pad == B and d_in == input_dim:
        return out_padded
    return out_padded[:B, :input_dim]


# --------------------------------------------------------------------------------------
# Init & reference
# --------------------------------------------------------------------------------------
def init_mlp_params(key, input_dim, hidden_dim):
    """nn.Linear-style uniform(-1/sqrt(fan_in), 1/sqrt(fan_in)) init; weights stored (in, out)."""
    ks = jax.random.split(key, 6)

    def linear(kw, kb, fan_in, fan_out):
        bound = 1.0 / jnp.sqrt(fan_in)
        w = jax.random.uniform(kw, (fan_out, fan_in), jnp.float32, -bound, bound).T
        b = jax.random.uniform(kb, (1, fan_out), jnp.float32, -bound, bound)
        return w, b

    w1, b1 = linear(ks[0], ks[1], input_dim, hidden_dim)
    w2, b2 = linear(ks[2], ks[3], hidden_dim, hidden_dim)
    w3, b3 = linear(ks[4], ks[5], hidden_dim, input_dim)
    return {"w1": w1, "b1": b1, "w2": w2, "b2": b2, "w3": w3, "b3": b3}


def mlp_ref(x, p):
    h1 = jnp.maximum(x @ p["w1"] + p["b1"], 0.0)
    h2 = jnp.maximum(h1 @ p["w2"] + p["b2"], 0.0)
    return h2 @ p["w3"] + p["b3"]


if __name__ == "__main__":
    key = jax.random.PRNGKey(0)
    k_x, k_p = jax.random.split(key)

    batch, input_dim, hidden_dim = 8, 16, 32
    x = jax.random.normal(k_x, (batch, input_dim), jnp.float32)
    params = init_mlp_params(k_p, input_dim, hidden_dim)
    ref = mlp_ref(x, params)

    # f32 fused path: zero padding is exact, must match tightly.
    p32, m32 = prepare_mlp_params(params, compute_dtype=jnp.float32)
    out_f32 = jax.block_until_ready(mlp_forward(x, p32, m32))
    assert out_f32.shape == (batch, input_dim)
    assert jnp.allclose(out_f32, ref, atol=1e-5, rtol=1e-5)

    # Streamed (weights-too-big) fallback path, forced for coverage: also exact in f32.
    out_stream = jax.block_until_ready(mlp_forward(x, p32, m32, force_streaming=True))
    assert out_stream.shape == (batch, input_dim)
    assert jnp.allclose(out_stream, ref, atol=1e-5, rtol=1e-5)

    # Default bf16 compute path (f32 accumulation): loose tolerance vs f32 reference.
    pbf, mbf = prepare_mlp_params(params, compute_dtype=jnp.bfloat16)
    out_bf16 = jax.block_until_ready(mlp_forward(x, pbf, mbf))
    assert out_bf16.shape == (batch, input_dim)
    assert jnp.allclose(out_bf16, ref, atol=3e-2, rtol=3e-2)

    print("KERNEL_OK")
</pallas_src>

<mosaic_0001>
module attributes {stable_mosaic.version = 11 : i64} {
  func.func @_mlp_fused_kernel(%arg0: i32, %arg1: memref<8x128xf32, #tpu.memory_space<vmem>>, %arg2: memref<128x128xf32, #tpu.memory_space<vmem>>, %arg3: memref<1x128xf32, #tpu.memory_space<vmem>>, %arg4: memref<128x128xf32, #tpu.memory_space<vmem>>, %arg5: memref<1x128xf32, #tpu.memory_space<vmem>>, %arg6: memref<128x128xf32, #tpu.memory_space<vmem>>, %arg7: memref<1x128xf32, #tpu.memory_space<vmem>>, %arg8: memref<8x128xf32, #tpu.memory_space<vmem>>, %arg9: memref<8x128xf32, #tpu.memory_space<vmem>>) attributes {dimension_semantics = [#tpu.dimension_semantics<parallel>], iteration_bounds = array<i64: 1>, scalar_prefetch = 0 : i64, scratch_operands = 1 : i64, tpu.core_type = #tpu.core_type<tc>, window_params = [{transform_indices = @transform_0, window_bounds = array<i64: 8, 128>}, {pipeline_mode = #tpu.pipeline_mode<synchronous>, transform_indices = @transform_1, window_bounds = array<i64: 128, 128>}, {pipeline_mode = #tpu.pipeline_mode<synchronous>, transform_indices = @transform_2, window_bounds = array<i64: 1, 128>}, {pipeline_mode = #tpu.pipeline_mode<synchronous>, transform_indices = @transform_3, window_bounds = array<i64: 128, 128>}, {pipeline_mode = #tpu.pipeline_mode<synchronous>, transform_indices = @transform_4, window_bounds = array<i64: 1, 128>}, {pipeline_mode = #tpu.pipeline_mode<synchronous>, transform_indices = @transform_5, window_bounds = array<i64: 128, 128>}, {pipeline_mode = #tpu.pipeline_mode<synchronous>, transform_indices = @transform_6, window_bounds = array<i64: 1, 128>}, {transform_indices = @transform_7, window_bounds = array<i64: 8, 128>}]} {
    %c0 = arith.constant 0 : index
    %c0_0 = arith.constant 0 : index
    %0 = vector.load %arg1[%c0, %c0_0] : memref<8x128xf32, #tpu.memory_space<vmem>>, vector<8x128xf32>
    %c0_1 = arith.constant 0 : index
    %c0_2 = arith.constant 0 : index
    %1 = vector.load %arg2[%c0_1, %c0_2] : memref<128x128xf32, #tpu.memory_space<vmem>>, vector<128x128xf32>
    %cst = arith.constant dense<0.000000e+00> : vector<8x128xf32>
    %2 = tpu.matmul %0, %1, %cst {dimension_numbers = #tpu.dot_dimension_numbers<[1], [0], [0], [1], [0, 0, 1, 1], [], []>} : vector<8x128xf32>, vector<128x128xf32>, vector<8x128xf32> -> vector<8x128xf32>
    %c0_3 = arith.constant 0 : index
    %c0_4 = arith.constant 0 : index
    %3 = vector.load %arg3[%c0_3, %c0_4] : memref<1x128xf32, #tpu.memory_space<vmem>>, vector<1x128xf32>
    %4 = vector.broadcast %3 : vector<1x128xf32> to vector<8x128xf32>
    %5 = arith.addf %2, %4 : vector<8x128xf32>
    %cst_5 = arith.constant 0.000000e+00 : f32
    %6 = vector.broadcast %cst_5 : f32 to vector<8x128xf32>
    %7 = arith.maximumf %5, %6 : vector<8x128xf32>
    %c0_6 = arith.constant 0 : index
    %c0_7 = arith.constant 0 : index
    %8 = vector.load %arg9[%c0_6, %c0_7] : memref<8x128xf32, #tpu.memory_space<vmem>>, vector<8x128xf32>
    tpu.vector_store %arg9[%c0_6, %c0_7], %7 {strides = array<i32>} : memref<8x128xf32, #tpu.memory_space<vmem>>, vector<8x128xf32>,
    %c0_8 = arith.constant 0 : index
    %c0_9 = arith.constant 0 : index
    %9 = vector.load %arg9[%c0_8, %c0_9] : memref<8x128xf32, #tpu.memory_space<vmem>>, vector<8x128xf32>
    %c0_10 = arith.constant 0 : index
    %c0_11 = arith.constant 0 : index
    %10 = vector.load %arg4[%c0_10, %c0_11] : memref<128x128xf32, #tpu.memory_space<vmem>>, vector<128x128xf32>
    %cst_12 = arith.constant dense<0.000000e+00> : vector<8x128xf32>
    %11 = tpu.matmul %9, %10, %cst_12 {dimension_numbers = #tpu.dot_dimension_numbers<[1], [0], [0], [1], [0, 0, 1, 1], [], []>} : vector<8x128xf32>, vector<128x128xf32>, vector<8x128xf32> -> vector<8x128xf32>
    %c0_13 = arith.constant 0 : index
    %c0_14 = arith.constant 0 : index
    %12 = vector.load %arg5[%c0_13, %c0_14] : memref<1x128xf32, #tpu.memory_space<vmem>>, vector<1x128xf32>
    %13 = vector.broadcast %12 : vector<1x128xf32> to vector<8x128xf32>
    %14 = arith.addf %11, %13 : vector<8x128xf32>
    %cst_15 = arith.constant 0.000000e+00 : f32
    %15 = vector.broadcast %cst_15 : f32 to vector<8x128xf32>
    %16 = arith.maximumf %14, %15 : vector<8x128xf32>
    %c0_16 = arith.constant 0 : index
    %c0_17 = arith.constant 0 : index
    %17 = vector.load %arg9[%c0_16, %c0_17] : memref<8x128xf32, #tpu.memory_space<vmem>>, vector<8x128xf32>
    tpu.vector_store %arg9[%c0_16, %c0_17], %16 {strides = array<i32>} : memref<8x128xf32, #tpu.memory_space<vmem>>, vector<8x128xf32>,
    %c0_18 = arith.constant 0 : index
    %c0_19 = arith.constant 0 : index
    %18 = vector.load %arg9[%c0_18, %c0_19] : memref<8x128xf32, #tpu.memory_space<vmem>>, vector<8x128xf32>
    %c0_20 = arith.constant 0 : index
    %c0_21 = arith.constant 0 : index
    %19 = vector.load %arg6[%c0_20, %c0_21] : memref<128x128xf32, #tpu.memory_space<vmem>>, vector<128x128xf32>
    %cst_22 = arith.constant dense<0.000000e+00> : vector<8x128xf32>
    %20 = tpu.matmul %18, %19, %cst_22 {dimension_numbers = #tpu.dot_dimension_numbers<[1], [0], [0], [1], [0, 0, 1, 1], [], []>} : vector<8x128xf32>, vector<128x128xf32>, vector<8x128xf32> -> vector<8x128xf32>
    %c0_23 = arith.constant 0 : index
    %c0_24 = arith.constant 0 : index
    %21 = vector.load %arg7[%c0_23, %c0_24] : memref<1x128xf32, #tpu.memory_space<vmem>>, vector<1x128xf32>
    %22 = vector.broadcast %21 : vector<1x128xf32> to vector<8x128xf32>
    %23 = arith.addf %20, %22 : vector<8x128xf32>
    %c0_25 = arith.constant 0 : index
    %c0_26 = arith.constant 0 : index
    %24 = vector.load %arg8[%c0_25, %c0_26] : memref<8x128xf32, #tpu.memory_space<vmem>>, vector<8x128xf32>
    tpu.vector_store %arg8[%c0_25, %c0_26], %23 {strides = array<i32>} : memref<8x128xf32, #tpu.memory_space<vmem>>, vector<8x128xf32>,
    return
  }
  func.func @transform_0(%arg0: i32) -> (i32, i32) {
    %c0_i32 = arith.constant 0 : i32
    %c0_i32_0 = arith.constant 0 : i32
    return %arg0, %c0_i32 : i32, i32
  }
  func.func @transform_1(%arg0: i32) -> (i32, i32) {
    %c0_i32 = arith.constant 0 : i32
    %c0_i32_0 = arith.constant 0 : i32
    %c0_i32_1 = arith.constant 0 : i32
    return %c0_i32, %c0_i32_0 : i32, i32
  }
  func.func @transform_2(%arg0: i32) -> (i32, i32) {
    %c0_i32 = arith.constant 0 : i32
    %c0_i32_0 = arith.constant 0 : i32
    %c0_i32_1 = arith.constant 0 : i32
    return %c0_i32, %c0_i32_0 : i32, i32
  }
  func.func @transform_3(%arg0: i32) -> (i32, i32) {
    %c0_i32 = arith.constant 0 : i32
    %c0_i32_0 = arith.constant 0 : i32
    %c0_i32_1 = arith.constant 0 : i32
    return %c0_i32, %c0_i32_0 : i32, i32
  }
  func.func @transform_4(%arg0: i32) -> (i32, i32) {
    %c0_i32 = arith.constant 0 : i32
    %c0_i32_0 = arith.constant 0 : i32
    %c0_i32_1 = arith.constant 0 : i32
    return %c0_i32, %c0_i32_0 : i32, i32
  }
  func.func @transform_5(%arg0: i32) -> (i32, i32) {
    %c0_i32 = arith.constant 0 : i32
    %c0_i32_0 = arith.constant 0 : i32
    %c0_i32_1 = arith.constant 0 : i32
    return %c0_i32, %c0_i32_0 : i32, i32
  }
  func.func @transform_6(%arg0: i32) -> (i32, i32) {
    %c0_i32 = arith.constant 0 : i32
    %c0_i32_0 = arith.constant 0 : i32
    %c0_i32_1 = arith.constant 0 : i32
    return %c0_i32, %c0_i32_0 : i32, i32
  }
  func.func @transform_7(%arg0: i32) -> (i32, i32) {
    %c0_i32 = arith.constant 0 : i32
    %c0_i32_0 = arith.constant 0 : i32
    return %arg0, %c0_i32 : i32, i32
  }
}

</mosaic_0001>

<bundles_post_ra>
// kernel: tpu_custom_call.1
= control target key start
LH: loop header
LB: loop body
LE: loop exit
PB: predicated region body
PF: predicated region fallthrough
CT: control target
= control target key end

     0   :  { %12 = vsyncpa [#allocation4], 0  ;;  %s796_s0 = inlined_call_operand.hbm [shape: f32[8,128], index: 0, kind: input, shape index: {}]   ;;  %s797_s1 = inlined_call_operand.hbm [shape: f32[128,128], index: 1, kind: input, shape index: {}]   ;;  %s798_s2 = inlined_call_operand.vmem [shape: f32[1,128], index: 2, kind: input, shape index: {}]   ;;  %s799_s3 = inlined_call_operand.hbm [shape: f32[128,128], index: 3, kind: input, shape index: {}]   ;;  %s800_s4 = inlined_call_operand.vmem [shape: f32[1,128], index: 4, kind: input, shape index: {}]   ;;  %s801_s5 = inlined_call_operand.hbm [shape: f32[128,128], index: 5, kind: input, shape index: {}]   ;;  %s802_s6 = inlined_call_operand.vmem [shape: f32[1,128], index: 6, kind: input, shape index: {}]   ;;  %s803_s7 = inlined_call_operand.hbm [shape: f32[8,128], index: 7, kind: output, shape index: {}]  }
   0x1   :  { %13 = vsyncpa [#allocation7], 0 }
   0x2   :  { %14 = vsyncpa [#allocation10], 0 }
   0x3   :  { %15 = vsyncpa [#allocation5], 0  ;;  %s660_s24 = smov [#allocation6]  }
   0x4   :  { %s31_s25 = sshll.u32 %s660_s24, 4  ;;  %s32_s25 = int_to_ptr.vmem [resolvable:$true] %s31_s25 }
   0x5   :  { %s560_s26 = scalar_lea.vmem %s32_s25, 2048  ;;  %p565_p1 = scmp.lt.s32.totalorder %s32_s25, %s32_s25 }
   0x6   :  { %p561_p0 = scmp.ne.s32.totalorder %s32_s25, %s560_s26  ;;  %p566_p2 = scmp.lt.s32.totalorder %s560_s26, %s560_s26 }
   0x8   :  { %p567_p3 = por %p566_p2, %p565_p1 }
   0xa   :  { %p568_p4 = pnand %p567_p3, %p561_p0 }
   0xc   :  { %571 = shalt.err (!%p568_p4)
}
   0xd   :  { %s661_s27 = smov 128   ;;  %s662_s28 = smov 8  }
   0xe   :  { %37 = dma.hbm_to_vmem [thread:$0]  %s797_s1, 2048, %s32_s25, [#allocation7], %s661_s27, %s661_s27, %s662_s28  }
   0xf   :  { %s663_s8 = smov [#allocation3]   ;;  %s664_s10 = smov [#allocation8]  }
  0x10   :  { %s22_s9 = sshll.u32 %s663_s8, 4  ;;  %s45_s11 = sshll.u32 %s664_s10, 4  ;;  %s23_s9 = int_to_ptr.vmem [resolvable:$true] %s22_s9  ;;  %s46_s11 = int_to_ptr.vmem [resolvable:$true] %s45_s11 }
  0x11   :  { %s580_s12 = scalar_lea.vmem %s23_s9, 128  ;;  %p585_p6 = scmp.lt.s32.totalorder %s23_s9, %s23_s9 }
  0x12   :  { %p581_p5 = scmp.ne.s32.totalorder %s23_s9, %s580_s12  ;;  %p586_p7 = scmp.lt.s32.totalorder %s580_s12, %s580_s12 }
  0x14   :  { %p587_p8 = por %p586_p7, %p585_p6 }
  0x16   :  { %p588_p9 = pnand %p587_p8, %p581_p5 }
  0x18   :  { %591 = shalt.err (!%p588_p9)
}
  0x19   :  { %25 = dma.hbm_to_vmem [thread:$0]  %s796_s0, 128, %s23_s9, [#allocation4]  }
  0x1a   :  { %s600_s15 = scalar_lea.vmem %s46_s11, 2048  ;;  %p605_p11 = scmp.lt.s32.totalorder %s46_s11, %s46_s11 }
  0x1b   :  { %p601_p10 = scmp.ne.s32.totalorder %s46_s11, %s600_s15  ;;  %p606_p12 = scmp.lt.s32.totalorder %s600_s15, %s600_s15 }
  0x1d   :  { %p607_p13 = por %p606_p12, %p605_p11 }
  0x1f   :  { %p608_p0 = pnand %p607_p13, %p601_p10 }
  0x21   :  { %611 = shalt.err (!%p608_p0)
}
  0x22   :  { %51 = dma.hbm_to_vmem [thread:$0]  %s799_s3, 2048, %s46_s11, [#allocation7], %s661_s27, %s661_s27, %s662_s28  }
  0x23   :  { %s665_s17 = smov [#allocation9]  }
  0x24   :  { %s59_s18 = sshll.u32 %s665_s17, 4  ;;  %s60_s18 = int_to_ptr.vmem [resolvable:$true] %s59_s18 }
  0x25   :  { %s620_s19 = scalar_lea.vmem %s60_s18, 2048  ;;  %p625_p2 = scmp.lt.s32.totalorder %s60_s18, %s60_s18 }
  0x26   :  { %p621_p1 = scmp.ne.s32.totalorder %s60_s18, %s620_s19  ;;  %p626_p3 = scmp.lt.s32.totalorder %s620_s19, %s620_s19 }
  0x28   :  { %p627_p4 = por %p626_p3, %p625_p2 }
  0x2a   :  { %p628_p5 = pnand %p627_p4, %p621_p1 }
  0x2c   :  { %631 = shalt.err (!%p628_p5)
}
  0x2d   :  { %65 = dma.hbm_to_vmem [thread:$0]  %s801_s5, 2048, %s60_s18, [#allocation10], %s661_s27, %s661_s27, %s662_s28  }
  0x2e   :  { %652 = dma.done.wait [#allocation4], 128  }
  0x2f   :  { %653 = vsyncadd [#allocation4], 4294967168 }
  0x30   :  { %654 = dma.done.wait [#allocation7], 4096  }
  0x31   :  { %655 = vsyncadd [#allocation7], 4294963200 }
  0x32   :  { %656 = dma.done.wait [#allocation10], 2048  }
  0x33   :  { %657 = vsyncadd [#allocation10], 4294965248  ;;  %v666_v0 = vmov 0.0   ;;  %vm667_vm0 = vmmov 0   ;;  %v96_v1 = vld [vmem:[#allocation6 + $0x78] sm:$0xff]  ;;  %v95_v2 = vld [vmem:[#allocation6 + $0x70] sm:$0xff] }
  0x34   :  { %438 = vmatprep.subr.mxu0 %v666_v0  ;;  %470 = vmatprep.mubr.msk.f32.mxu0 %vm667_vm0, %v666_v0  ;;  %v94_v3 = vld [vmem:[#allocation6 + $0x68] sm:$0xff]  ;;  %v93_v4 = vld [vmem:[#allocation6 + $0x60] sm:$0xff]  ;;  %v192_v5 = vld [vmem:[#allocation8 + $0x78] sm:$0xff]  ;;  %s668_s24 = smov [#allocation11]  }
  0x35   :  { %473 = vmatprep.subr.mxu1 %v666_v0  ;;  %505 = vmatprep.mubr.msk.f32.mxu1 %vm667_vm0, %v666_v0  ;;  %v92_v6 = vld [vmem:[#allocation6 + $0x58] sm:$0xff]  ;;  %v191_v7 = vld [vmem:[#allocation8 + $0x70] sm:$0xff]  ;;  %v190_v8 = vld [vmem:[#allocation8 + $0x68] sm:$0xff]  ;;  %s373_s25 = sshll.u32 %s668_s24, 4  ;;  %s374_s25 = int_to_ptr.vmem [resolvable:$true] %s373_s25 }
  0x36   :  { %439 = vmatpush3.msra.mxu0 %v96_v1  ;;  %474 = vmatpush3.msra.mxu1 %v192_v5  ;;  %v91_v9 = vld [vmem:[#allocation6 + $0x50] sm:$0xff]  ;;  %v189_v10 = vld [vmem:[#allocation8 + $0x60] sm:$0xff]  ;;  %v90_v11 = vld [vmem:[#allocation6 + $0x48] sm:$0xff]  ;;  %s632_s26 = scalar_lea.vmem %s374_s25, 128  ;;  %p637_p7 = scmp.lt.s32.totalorder %s374_s25, %s374_s25 }
  0x37   :  { %440 = vmatprep.subr.mxu0 %v666_v0  ;;  %475 = vmatprep.subr.mxu1 %v666_v0  ;;  %v188_v12 = vld [vmem:[#allocation8 + $0x58] sm:$0xff]  ;;  %v89_v13 = vld [vmem:[#allocation6 + $0x40] sm:$0xff]  ;;  %v187_v14 = vld [vmem:[#allocation8 + $0x50] sm:$0xff]  ;;  %p633_p6 = scmp.ne.s32.totalorder %s374_s25, %s632_s26  ;;  %p638_p8 = scmp.lt.s32.totalorder %s632_s26, %s632_s26 }
  0x38   :  { %441 = vmatpush3.msra.mxu0 %v95_v2  ;;  %476 = vmatpush3.msra.mxu1 %v191_v7  ;;  %v88_v15 = vld [vmem:[#allocation6 + $0x38] sm:$0xff]  ;;  %v186_v16 = vld [vmem:[#allocation8 + $0x48] sm:$0xff]  ;;  %v87_v17 = vld [vmem:[#allocation6 + $0x30] sm:$0xff] }
  0x39   :  { %442 = vmatprep.subr.mxu0 %v666_v0  ;;  %477 = vmatprep.subr.mxu1 %v666_v0  ;;  %v185_v18 = vld [vmem:[#allocation8 + $0x40] sm:$0xff]  ;;  %v86_v19 = vld [vmem:[#allocation6 + $0x28] sm:$0xff]  ;;  %v184_v20 = vld [vmem:[#allocation8 + $0x38] sm:$0xff]  ;;  %p639_p9 = por %p638_p8, %p637_p7 }
  0x3a   :  { %443 = vmatpush3.msra.mxu0 %v94_v3  ;;  %478 = vmatpush3.msra.mxu1 %v190_v8  ;;  %v85_v21 = vld [vmem:[#allocation6 + $0x20] sm:$0xff]  ;;  %v183_v22 = vld [vmem:[#allocation8 + $0x30] sm:$0xff]  ;;  %v84_v23 = vld [vmem:[#allocation6 + $0x18] sm:$0xff] }
  0x3b   :  { %444 = vmatprep.subr.mxu0 %v666_v0  ;;  %479 = vmatprep.subr.mxu1 %v666_v0  ;;  %v182_v24 = vld [vmem:[#allocation8 + $0x28] sm:$0xff]  ;;  %v83_v25 = vld [vmem:[#allocation6 + $0x10] sm:$0xff]  ;;  %v181_v26 = vld [vmem:[#allocation8 + $0x20] sm:$0xff]  ;;  %p640_p10 = pnand %p639_p9, %p633_p6 }
  0x3c   :  { %445 = vmatpush3.msra.mxu0 %v93_v4  ;;  %480 = vmatpush3.msra.mxu1 %v189_v10  ;;  %v82_v27 = vld [vmem:[#allocation6 + $0x8] sm:$0xff]  ;;  %v180_v28 = vld [vmem:[#allocation8 + $0x18] sm:$0xff]  ;;  %v81_v29 = vld [vmem:[#allocation6] sm:$0xff] }
  0x3d   :  { %446 = vmatprep.subr.mxu0 %v666_v0  ;;  %481 = vmatprep.subr.mxu1 %v666_v0  ;;  %v80_v30 = vld [vmem:[#allocation3] sm:$0xff]  ;;  %v179_v31 = vld [vmem:[#allocation8 + $0x10] sm:$0xff]  ;;  %v178_v32 = vld [vmem:[#allocation8 + $0x8] sm:$0xff] }
  0x3e   :  { %447 = vmatpush3.msra.mxu0 %v92_v6  ;;  %482 = vmatpush3.msra.mxu1 %v188_v12  ;;  %v177_v33 = vld [vmem:[#allocation8] sm:$0xff]  ;;  %v288_v34 = vld [vmem:[#allocation9 + $0x78] sm:$0xff]  ;;  %v287_v35 = vld [vmem:[#allocation9 + $0x70] sm:$0xff] }
  0x3f   :  { %448 = vmatprep.subr.mxu0 %v666_v0  ;;  %483 = vmatprep.subr.mxu1 %v666_v0  ;;  %v286_v36 = vld [vmem:[#allocation9 + $0x68] sm:$0xff]  ;;  %v285_v37 = vld [vmem:[#allocation9 + $0x60] sm:$0xff]  ;;  %v284_v38 = vld [vmem:[#allocation9 + $0x58] sm:$0xff] }
  0x40   :  { %449 = vmatpush3.msra.mxu0 %v91_v9  ;;  %484 = vmatpush3.msra.mxu1 %v187_v14  ;;  %v283_v39 = vld [vmem:[#allocation9 + $0x50] sm:$0xff]  ;;  %v282_v40 = vld [vmem:[#allocation9 + $0x48] sm:$0xff]  ;;  %v281_v41 = vld [vmem:[#allocation9 + $0x40] sm:$0xff] }
  0x41   :  { %450 = vmatprep.subr.mxu0 %v666_v0  ;;  %485 = vmatprep.subr.mxu1 %v666_v0  ;;  %v280_v42 = vld [vmem:[#allocation9 + $0x38] sm:$0xff]  ;;  %v279_v43 = vld [vmem:[#allocation9 + $0x30] sm:$0xff]  ;;  %v278_v44 = vld [vmem:[#allocation9 + $0x28] sm:$0xff] }
  0x42   :  { %451 = vmatpush3.msra.mxu0 %v90_v11  ;;  %486 = vmatpush3.msra.mxu1 %v186_v16  ;;  %v277_v45 = vld [vmem:[#allocation9 + $0x20] sm:$0xff]  ;;  %v276_v46 = vld [vmem:[#allocation9 + $0x18] sm:$0xff]  ;;  %v275_v52 = vld [vmem:[#allocation9 + $0x10] sm:$0xff] }
  0x43   :  { %452 = vmatprep.subr.mxu0 %v666_v0  ;;  %487 = vmatprep.subr.mxu1 %v666_v0  ;;  %v384_v47 = vld [vmem:[%s798_s2] ss:$0 sm:$0xff]  ;;  %v274_v53 = vld [vmem:[#allocation9 + $0x8] sm:$0xff]  ;;  %v273_v54 = vld [vmem:[#allocation9] sm:$0xff] }
  0x44   :  { %453 = vmatpush3.msra.mxu0 %v89_v13  ;;  %488 = vmatpush3.msra.mxu1 %v185_v18  ;;  %v385_v55 = vld [vmem:[%s800_s4] ss:$0 sm:$0xff] }
  0x45   :  { %454 = vmatprep.subr.mxu0 %v666_v0  ;;  %489 = vmatprep.subr.mxu1 %v666_v0  ;;  %v386_v60 = vld [vmem:[%s802_s6] ss:$0 sm:$0xff] }
  0x46   :  { %455 = vmatpush3.msra.mxu0 %v88_v15  ;;  %490 = vmatpush3.msra.mxu1 %v184_v20 }
  0x47   :  { %456 = vmatprep.subr.mxu0 %v666_v0  ;;  %491 = vmatprep.subr.mxu1 %v666_v0 }
  0x48   :  { %457 = vmatpush3.msra.mxu0 %v87_v17  ;;  %492 = vmatpush3.msra.mxu1 %v183_v22 }
  0x49   :  { %458 = vmatprep.subr.mxu0 %v666_v0  ;;  %493 = vmatprep.subr.mxu1 %v666_v0 }
  0x4a   :  { %459 = vmatpush3.msra.mxu0 %v86_v19  ;;  %494 = vmatpush3.msra.mxu1 %v182_v24 }
  0x4b   :  { %460 = vmatprep.subr.mxu0 %v666_v0  ;;  %495 = vmatprep.subr.mxu1 %v666_v0 }
  0x4c   :  { %461 = vmatpush3.msra.mxu0 %v85_v21  ;;  %496 = vmatpush3.msra.mxu1 %v181_v26 }
  0x4d   :  { %462 = vmatprep.subr.mxu0 %v666_v0  ;;  %497 = vmatprep.subr.mxu1 %v666_v0 }
  0x4e   :  { %463 = vmatpush3.msra.mxu0 %v84_v23  ;;  %498 = vmatpush3.msra.mxu1 %v180_v28 }
  0x4f   :  { %464 = vmatprep.subr.mxu0 %v666_v0  ;;  %499 = vmatprep.subr.mxu1 %v666_v0 }
  0x50   :  { %465 = vmatpush3.msra.mxu0 %v83_v25  ;;  %500 = vmatpush3.msra.mxu1 %v179_v31 }
  0x51   :  { %466 = vmatprep.subr.mxu0 %v666_v0  ;;  %501 = vmatprep.subr.mxu1 %v666_v0 }
  0x52   :  { %467 = vmatpush3.msra.mxu0 %v82_v27  ;;  %502 = vmatpush3.msra.mxu1 %v178_v32 }
  0x53   :  { %468 = vmatprep.subr.mxu0 %v666_v0  ;;  %503 = vmatprep.subr.mxu1 %v666_v0 }
  0x54   :  { %469 = vmatpush3.msra.mxu0 %v81_v29  ;;  %504 = vmatpush3.msra.mxu1 %v177_v33 }
  0x55   :  { %471 = vmatmul.mubr.f32.vlgmr.msra.gmra.mxu0 %v80_v30  ;;  %508 = vmatprep.subr.mxu0 %v666_v0 }
  0x56   :  { %540 = vmatprep.mubr.msk.f32.mxu0 %vm667_vm0, %v666_v0  ;;  %509 = vmatpush3.msra.mxu0 %v288_v34 }
  0x57   :  { %510 = vmatprep.subr.mxu0 %v666_v0 }
  0x58   :  { %511 = vmatpush3.msra.mxu0 %v287_v35 }
  0x59   :  { %512 = vmatprep.subr.mxu0 %v666_v0 }
  0x5a   :  { %513 = vmatpush3.msra.mxu0 %v286_v36 }
  0x5b   :  { %514 = vmatprep.subr.mxu0 %v666_v0 }
  0x5c   :  { %515 = vmatpush3.msra.mxu0 %v285_v37 }
  0x5d   :  { %516 = vmatprep.subr.mxu0 %v666_v0 }
  0x5e   :  { %517 = vmatpush3.msra.mxu0 %v284_v38 }
  0x5f   :  { %518 = vmatprep.subr.mxu0 %v666_v0 }
  0x60   :  { %519 = vmatpush3.msra.mxu0 %v283_v39 }
  0x61   :  { %520 = vmatprep.subr.mxu0 %v666_v0 }
  0x62   :  { %521 = vmatpush3.msra.mxu0 %v282_v40 }
  0x63   :  { %522 = vmatprep.subr.mxu0 %v666_v0 }
  0x64   :  { %523 = vmatpush3.msra.mxu0 %v281_v41 }
  0x65   :  { %524 = vmatprep.subr.mxu0 %v666_v0 }
  0x66   :  { %525 = vmatpush3.msra.mxu0 %v280_v42 }
  0x67   :  { %526 = vmatprep.subr.mxu0 %v666_v0 }
  0x68   :  { %527 = vmatpush3.msra.mxu0 %v279_v43 }
  0x69   :  { %528 = vmatprep.subr.mxu0 %v666_v0 }
  0x6a   :  { %529 = vmatpush3.msra.mxu0 %v278_v44 }
  0x6b   :  { %530 = vmatprep.subr.mxu0 %v666_v0 }
  0x6c   :  { %531 = vmatpush3.msra.mxu0 %v277_v45 }
  0x6d   :  { %532 = vmatprep.subr.mxu0 %v666_v0 }
  0x6e   :  { %533 = vmatpush3.msra.mxu0 %v276_v46 }
  0x6f   :  { %534 = vmatprep.subr.mxu0 %v666_v0 }
  0x70   :  { %535 = vmatpush3.msra.mxu0 %v275_v52 }
  0x71   :  { %536 = vmatprep.subr.mxu0 %v666_v0 }
  0x72   :  { %537 = vmatpush3.msra.mxu0 %v274_v53 }
  0x73   :  { %538 = vmatprep.subr.mxu0 %v666_v0 }
  0x74   :  { %539 = vmatpush3.msra.mxu0 %v273_v54 }
 0x115   :  { %v170_v48 = vpop.f32.mrf.mxu0 }
 0x116   :  { %v171_v49 = vadd.f32 %v384_v47, %v170_v48 }
 0x117   :  { %v472_v50 = vpop.f32.mrf.mxu0 }
 0x118   :  { %v174_v51 = vmax.f32 %v171_v49, 0.0 }
 0x11a   :  { %506 = vmatmul.mubr.f32.vlgmr.msra.gmra.mxu1 %v174_v51 }
 0x1da   :  { %v266_v56 = vpop.f32.mrf.mxu1 }
 0x1db   :  { %v267_v57 = vadd.f32 %v385_v55, %v266_v56 }
 0x1dc   :  { %v507_v58 = vpop.f32.mrf.mxu1 }
 0x1dd   :  { %v270_v59 = vmax.f32 %v267_v57, 0.0 }
 0x1df   :  { %541 = vmatmul.mubr.f32.vlgmr.msra.gmra.mxu0 %v270_v59 }
 0x29f   :  { %v362_v61 = vpop.f32.mrf.mxu0 }
 0x2a0   :  { %v363_v62 = vadd.f32 %v386_v60, %v362_v61 }
 0x2a1   :  { %v542_v63 = vpop.f32.mrf.mxu0 }
 0x2a2   :  { %366 = vst [vmem:[#allocation11] sm:$0xff] %v363_v62 }
 0x2a3   :  { %643 = shalt.err (!%p640_p10)
}
 0x2a4   :  { %376 = dma.vmem_to_hbm [thread:$0]  %s374_s25, 128, %s803_s7, [#allocation5]  }
 0x2a5   :  { %658 = dma.done.wait [#allocation5], 128  }
 0x2a6   :  { %659 = vsyncadd [#allocation5], 4294967168 }
 0x2a7   :  { %380 = vsyncpa [#allocation4], 1 }
 0x2a8   :  { %381 = vsyncpa [#allocation7], 1 }
 0x2a9   :  { %382 = vsyncpa [#allocation10], 1 }
 0x2aa   :  { %383 = vsyncpa [#allocation5], 1 }

</bundles_post_ra>
